<compile_context>
chip_gen: v7x
topology: tpu7x:2x2x1
jax: 0.10.0
libtpu: 0.0.40
codegen_flags: <defaults>
</compile_context>

<pallas_src>
import jax
import jax.numpy as jnp
from jax.experimental import pallas as pl
from jax.experimental.pallas import tpu as pltpu


def rawnet_kernel(xt_ref, w1x_ref, w1y_ref, b1_ref, w2_ref, b2_ref, w3_ref,
                  b3_ref, o_ref):
    # Batch on lanes (last dim), hidden units on sublanes. Elementwise in f32.
    x = xt_ref[...].astype(jnp.float32)          # (2, TB)
    px = x[0:1, :]                               # (1, TB)
    py = x[1:2, :]                               # (1, TB)

    # linear1 + tanh : K=2 contraction expressed as two lane-dense FMAs with
    # prepacked (H,1) weight columns (no per-step slicing of a (H,2) block).
    h1 = jnp.tanh(w1x_ref[...] * px + w1y_ref[...] * py + b1_ref[...])  # (H, TB)

    # linear2 + tanh : genuine (H,H) contraction -> MXU. bf16 operands
    # (single-pass MXU on all generations), f32 accumulation; RHS lane-dense.
    h2 = jnp.tanh(
        jnp.dot(w2_ref[...], h1.astype(jnp.bfloat16),
                preferred_element_type=jnp.float32)
        + b2_ref[...]
    )                                            # (H, TB)

    # linear3 (output width 1): VPU multiply + sublane reduce, bias from SMEM.
    logits = jnp.sum(w3_ref[...] * h2, axis=0, keepdims=True) + b3_ref[0, 0]  # (1, TB)

    # sigmoid(z) = 0.5 * tanh(z/2) + 0.5  -> one EUP op, exact.
    o_ref[...] = (0.5 * jnp.tanh(0.5 * logits) + 0.5).astype(o_ref.dtype)


def rawnet_forward(x, w1, b1, w2, b2, w3, b3, *, tb=8192):
    """RawNet forward pass.

    x:  (N, 2)
    w1: (H, 2),  b1: (H,)    (torch.nn.Linear convention: weight is (out, in))
    w2: (H, H),  b2: (H,)
    w3: (1, H),  b3: (1,)
    returns (N, 1)
    """
    n = x.shape[0]
    h = w1.shape[0]

    # Lane-aligned batch tile: multiple of 128 lanes, large by default to
    # amortize per-step overhead, but do not over-tile tiny batches.
    n128 = pl.cdiv(n, 128) * 128
    tb = max(128, min(tb, n128))
    # v7x: keep at least 2 grid steps when the batch allows it, so the
    # "parallel" grid axis shards across both TensorCores.
    if n128 >= 256:
        tb = min(tb, max(128, (n128 // 2) // 128 * 128))
    n_pad = pl.cdiv(n, tb) * tb
    grid = n_pad // tb

    # Batch on the lane (last) axis; pad only the tail (zero padding is sliced
    # off at the end, padded samples are never read back).
    xt = jnp.pad(x.astype(jnp.float32).T, ((0, 0), (0, n_pad - n)))

    w1f = w1.astype(jnp.float32)
    w1x = w1f[:, 0:1]                              # (H, 1) column for input x
    w1y = w1f[:, 1:2]                              # (H, 1) column for input y
    b1c = b1.reshape(h, 1).astype(jnp.float32)     # (H, 1)
    w2b = w2.astype(jnp.bfloat16)                  # (H, H) bf16 MXU operand
    b2c = b2.reshape(h, 1).astype(jnp.float32)     # (H, 1)
    w3c = w3.reshape(h, 1).astype(jnp.float32)     # (H, 1) column, sublane reduce
    b3s = b3.reshape(1, 1).astype(jnp.float32)     # (1, 1) scalar in SMEM

    cost = pl.CostEstimate(
        flops=2 * n_pad * h * (h + 3),
        transcendentals=n_pad * (2 * h + 1),
        bytes_accessed=12 * n_pad + 2 * h * h + 20 * h + 4,
    )

    out = pl.pallas_call(
        rawnet_kernel,
        out_shape=jax.ShapeDtypeStruct((1, n_pad), x.dtype),
        grid_spec=pltpu.PrefetchScalarGridSpec(
            num_scalar_prefetch=0,
            grid=(grid,),
            in_specs=[
                pl.BlockSpec((2, tb), lambda i: (0, i)),     # x^T tile (lane-dense)
                pl.BlockSpec((h, 1), lambda i: (0, 0)),      # w1 column (x)
                pl.BlockSpec((h, 1), lambda i: (0, 0)),      # w1 column (y)
                pl.BlockSpec((h, 1), lambda i: (0, 0)),      # b1
                pl.BlockSpec((h, h), lambda i: (0, 0)),      # W2 (resident, bf16)
                pl.BlockSpec((h, 1), lambda i: (0, 0)),      # b2
                pl.BlockSpec((h, 1), lambda i: (0, 0)),      # w3 column
                pl.BlockSpec(memory_space=pltpu.MemorySpace.SMEM),  # b3 scalar
            ],
            out_specs=pl.BlockSpec((1, tb), lambda i: (0, i)),  # lane-dense output
        ),
        compiler_params=pltpu.CompilerParams(
            dimension_semantics=("parallel",),
        ),
        cost_estimate=cost,
    )(xt, w1x, w1y, b1c, w2b, b2c, w3c, b3s)

    return out[0, :n].reshape(n, 1).astype(x.dtype)


if __name__ == "__main__":
    key = jax.random.PRNGKey(0)
    n, num_hid = 16, 32
    k_x, k_w1, k_b1, k_w2, k_b2, k_w3, k_b3 = jax.random.split(key, 7)

    x = jax.random.normal(k_x, (n, 2), jnp.float32)

    # Deterministic params mimicking torch.nn.Linear's default
    # U(-1/sqrt(fan_in), 1/sqrt(fan_in)) init, stored in torch (out, in) layout.
    bd1 = 1.0 / (2.0 ** 0.5)
    w1 = jax.random.uniform(k_w1, (num_hid, 2), jnp.float32, -bd1, bd1)
    b1 = jax.random.uniform(k_b1, (num_hid,), jnp.float32, -bd1, bd1)
    bd2 = 1.0 / (num_hid ** 0.5)
    w2 = jax.random.uniform(k_w2, (num_hid, num_hid), jnp.float32, -bd2, bd2)
    b2 = jax.random.uniform(k_b2, (num_hid,), jnp.float32, -bd2, bd2)
    bd3 = 1.0 / (num_hid ** 0.5)
    w3 = jax.random.uniform(k_w3, (1, num_hid), jnp.float32, -bd3, bd3)
    b3 = jax.random.uniform(k_b3, (1,), jnp.float32, -bd3, bd3)

    out = jax.block_until_ready(rawnet_forward(x, w1, b1, w2, b2, w3, b3))

    # Pure-JAX reference of the PyTorch RawNet forward pass.
    hp = jax.lax.Precision.HIGHEST
    hid1 = jnp.tanh(jnp.dot(x, w1.T, precision=hp) + b1)
    hid2 = jnp.tanh(jnp.dot(hid1, w2.T, precision=hp) + b2)
    ref = jax.nn.sigmoid(jnp.dot(hid2, w3.T, precision=hp) + b3)

    assert out.shape == (n, 1)
    assert jnp.allclose(out, ref, atol=2e-3, rtol=2e-3), (out, ref)
    print("KERNEL_OK")
</pallas_src>

<mosaic_0001>
module attributes {stable_mosaic.version = 11 : i64} {
  func.func @rawnet_kernel(%arg0: i32, %arg1: memref<2x128xf32, #tpu.memory_space<vmem>>, %arg2: memref<32x1xf32, #tpu.memory_space<vmem>>, %arg3: memref<32x1xf32, #tpu.memory_space<vmem>>, %arg4: memref<32x1xf32, #tpu.memory_space<vmem>>, %arg5: memref<32x32xbf16, #tpu.memory_space<vmem>>, %arg6: memref<32x1xf32, #tpu.memory_space<vmem>>, %arg7: memref<32x1xf32, #tpu.memory_space<vmem>>, %arg8: memref<1x1xf32, #tpu.memory_space<smem>>, %arg9: memref<1x128xf32, #tpu.memory_space<vmem>>) attributes {dimension_semantics = [#tpu.dimension_semantics<parallel>], iteration_bounds = array<i64: 1>, scalar_prefetch = 0 : i64, scratch_operands = 0 : i64, tpu.core_type = #tpu.core_type<tc>, window_params = [{transform_indices = @transform_0, window_bounds = array<i64: 2, 128>}, {pipeline_mode = #tpu.pipeline_mode<synchronous>, transform_indices = @transform_1, window_bounds = array<i64: 32, 1>}, {pipeline_mode = #tpu.pipeline_mode<synchronous>, transform_indices = @transform_2, window_bounds = array<i64: 32, 1>}, {pipeline_mode = #tpu.pipeline_mode<synchronous>, transform_indices = @transform_3, window_bounds = array<i64: 32, 1>}, {pipeline_mode = #tpu.pipeline_mode<synchronous>, transform_indices = @transform_4, window_bounds = array<i64: 32, 32>}, {pipeline_mode = #tpu.pipeline_mode<synchronous>, transform_indices = @transform_5, window_bounds = array<i64: 32, 1>}, {pipeline_mode = #tpu.pipeline_mode<synchronous>, transform_indices = @transform_6, window_bounds = array<i64: 32, 1>}, {transform_indices = @transform_7, window_bounds = array<i64: 1, 1>}, {transform_indices = @transform_8, window_bounds = array<i64: 1, 128>}]} {
    %c0 = arith.constant 0 : index
    %c0_0 = arith.constant 0 : index
    %0 = vector.load %arg1[%c0, %c0_0] : memref<2x128xf32, #tpu.memory_space<vmem>>, vector<2x128xf32>
    %1 = vector.extract_strided_slice %0 {offsets = [0, 0], sizes = [1, 128], strides = [1, 1]} : vector<2x128xf32> to vector<1x128xf32>
    %2 = vector.extract_strided_slice %0 {offsets = [1, 0], sizes = [1, 128], strides = [1, 1]} : vector<2x128xf32> to vector<1x128xf32>
    %c0_1 = arith.constant 0 : index
    %c0_2 = arith.constant 0 : index
    %3 = vector.load %arg2[%c0_1, %c0_2] : memref<32x1xf32, #tpu.memory_space<vmem>>, vector<32x1xf32>
    %4 = vector.broadcast %3 : vector<32x1xf32> to vector<32x128xf32>
    %5 = vector.broadcast %1 : vector<1x128xf32> to vector<32x128xf32>
    %6 = arith.mulf %4, %5 : vector<32x128xf32>
    %c0_3 = arith.constant 0 : index
    %c0_4 = arith.constant 0 : index
    %7 = vector.load %arg3[%c0_3, %c0_4] : memref<32x1xf32, #tpu.memory_space<vmem>>, vector<32x1xf32>
    %8 = vector.broadcast %7 : vector<32x1xf32> to vector<32x128xf32>
    %9 = vector.broadcast %2 : vector<1x128xf32> to vector<32x128xf32>
    %10 = arith.mulf %8, %9 : vector<32x128xf32>
    %11 = arith.addf %6, %10 : vector<32x128xf32>
    %c0_5 = arith.constant 0 : index
    %c0_6 = arith.constant 0 : index
    %12 = vector.load %arg4[%c0_5, %c0_6] : memref<32x1xf32, #tpu.memory_space<vmem>>, vector<32x1xf32>
    %13 = vector.broadcast %12 : vector<32x1xf32> to vector<32x128xf32>
    %14 = arith.addf %11, %13 : vector<32x128xf32>
    %15 = math.tanh %14 : vector<32x128xf32>
    %c0_7 = arith.constant 0 : index
    %c0_8 = arith.constant 0 : index
    %16 = vector.load %arg5[%c0_7, %c0_8] : memref<32x32xbf16, #tpu.memory_space<vmem>>, vector<32x32xbf16>
    %17 = arith.truncf %15 : vector<32x128xf32> to vector<32x128xbf16>
    %cst = arith.constant dense<0.000000e+00> : vector<32x128xf32>
    %18 = tpu.matmul %16, %17, %cst {dimension_numbers = #tpu.dot_dimension_numbers<[1], [0], [0], [1], [0, 0, 1, 1], [], []>} : vector<32x32xbf16>, vector<32x128xbf16>, vector<32x128xf32> -> vector<32x128xf32>
    %c0_9 = arith.constant 0 : index
    %c0_10 = arith.constant 0 : index
    %19 = vector.load %arg6[%c0_9, %c0_10] : memref<32x1xf32, #tpu.memory_space<vmem>>, vector<32x1xf32>
    %20 = vector.broadcast %19 : vector<32x1xf32> to vector<32x128xf32>
    %21 = arith.addf %18, %20 : vector<32x128xf32>
    %22 = math.tanh %21 : vector<32x128xf32>
    %c0_11 = arith.constant 0 : index
    %c0_12 = arith.constant 0 : index
    %23 = vector.load %arg7[%c0_11, %c0_12] : memref<32x1xf32, #tpu.memory_space<vmem>>, vector<32x1xf32>
    %24 = vector.broadcast %23 : vector<32x1xf32> to vector<32x128xf32>
    %25 = arith.mulf %24, %22 : vector<32x128xf32>
    %cst_13 = arith.constant dense<0.000000e+00> : vector<128xf32>
    %26 = vector.multi_reduction <add>, %25, %cst_13 [0] : vector<32x128xf32> to vector<128xf32>
    %27 = vector.shape_cast %26 : vector<128xf32> to vector<1x128xf32>
    %c0_14 = arith.constant 0 : index
    %c0_15 = arith.constant 0 : index
    %28 = memref.load %arg8[%c0_14, %c0_15] : memref<1x1xf32, #tpu.memory_space<smem>>
    %29 = vector.broadcast %28 : f32 to vector<1x128xf32>
    %30 = arith.addf %27, %29 : vector<1x128xf32>
    %cst_16 = arith.constant 5.000000e-01 : f32
    %31 = vector.broadcast %cst_16 : f32 to vector<1x128xf32>
    %32 = arith.mulf %31, %30 : vector<1x128xf32>
    %33 = math.tanh %32 : vector<1x128xf32>
    %cst_17 = arith.constant 5.000000e-01 : f32
    %34 = vector.broadcast %cst_17 : f32 to vector<1x128xf32>
    %35 = arith.mulf %34, %33 : vector<1x128xf32>
    %cst_18 = arith.constant 5.000000e-01 : f32
    %36 = vector.broadcast %cst_18 : f32 to vector<1x128xf32>
    %37 = arith.addf %35, %36 : vector<1x128xf32>
    %c0_19 = arith.constant 0 : index
    %c0_20 = arith.constant 0 : index
    %38 = vector.load %arg9[%c0_19, %c0_20] : memref<1x128xf32, #tpu.memory_space<vmem>>, vector<1x128xf32>
    tpu.vector_store %arg9[%c0_19, %c0_20], %37 {strides = array<i32>} : memref<1x128xf32, #tpu.memory_space<vmem>>, vector<1x128xf32>,
    return
  }
  func.func @transform_0(%arg0: i32) -> (i32, i32) {
    %c0_i32 = arith.constant 0 : i32
    %c0_i32_0 = arith.constant 0 : i32
    return %c0_i32, %arg0 : i32, i32
  }
  func.func @transform_1(%arg0: i32) -> (i32, i32) {
    %c0_i32 = arith.constant 0 : i32
    %c0_i32_0 = arith.constant 0 : i32
    %c0_i32_1 = arith.constant 0 : i32
    return %c0_i32, %c0_i32_0 : i32, i32
  }
  func.func @transform_2(%arg0: i32) -> (i32, i32) {
    %c0_i32 = arith.constant 0 : i32
    %c0_i32_0 = arith.constant 0 : i32
    %c0_i32_1 = arith.constant 0 : i32
    return %c0_i32, %c0_i32_0 : i32, i32
  }
  func.func @transform_3(%arg0: i32) -> (i32, i32) {
    %c0_i32 = arith.constant 0 : i32
    %c0_i32_0 = arith.constant 0 : i32
    %c0_i32_1 = arith.constant 0 : i32
    return %c0_i32, %c0_i32_0 : i32, i32
  }
  func.func @transform_4(%arg0: i32) -> (i32, i32) {
    %c0_i32 = arith.constant 0 : i32
    %c0_i32_0 = arith.constant 0 : i32
    %c0_i32_1 = arith.constant 0 : i32
    return %c0_i32, %c0_i32_0 : i32, i32
  }
  func.func @transform_5(%arg0: i32) -> (i32, i32) {
    %c0_i32 = arith.constant 0 : i32
    %c0_i32_0 = arith.constant 0 : i32
    %c0_i32_1 = arith.constant 0 : i32
    return %c0_i32, %c0_i32_0 : i32, i32
  }
  func.func @transform_6(%arg0: i32) -> (i32, i32) {
    %c0_i32 = arith.constant 0 : i32
    %c0_i32_0 = arith.constant 0 : i32
    %c0_i32_1 = arith.constant 0 : i32
    return %c0_i32, %c0_i32_0 : i32, i32
  }
  func.func @transform_7(%arg0: i32) -> (i32, i32) {
    %c0_i32 = arith.constant 0 : i32
    %c0_i32_0 = arith.constant 0 : i32
    %c0_i32_1 = arith.constant 0 : i32
    return %c0_i32, %c0_i32_0 : i32, i32
  }
  func.func @transform_8(%arg0: i32) -> (i32, i32) {
    %c0_i32 = arith.constant 0 : i32
    %c0_i32_0 = arith.constant 0 : i32
    return %c0_i32, %arg0 : i32, i32
  }
}

</mosaic_0001>

<bundles_post_ra>
// kernel: tpu_custom_call.1
= control target key start
LH: loop header
LB: loop body
LE: loop exit
PB: predicated region body
PF: predicated region fallthrough
CT: control target
= control target key end

     0   :  { %v356_v2 = vmov 0   ;;  %s489_s0 = inlined_call_operand.vmem [shape: f32[2,128], index: 0, kind: input, shape index: {}]   ;;  %s490_s1 = inlined_call_operand.vmem [shape: f32[32,1], index: 1, kind: input, shape index: {}]   ;;  %s491_s2 = inlined_call_operand.vmem [shape: f32[32,1], index: 2, kind: input, shape index: {}]   ;;  %s492_s3 = inlined_call_operand.vmem [shape: f32[32,1], index: 3, kind: input, shape index: {}]   ;;  %s493_s4 = inlined_call_operand.vmem [shape: bf16[32,32], index: 4, kind: input, shape index: {}]   ;;  %s494_s5 = inlined_call_operand.vmem [shape: f32[32,1], index: 5, kind: input, shape index: {}]   ;;  %s495_s6 = inlined_call_operand.vmem [shape: f32[32,1], index: 6, kind: input, shape index: {}]   ;;  %s496_s7 = inlined_call_operand.<no memory space> [shape: f32[1,1], index: 7, kind: input, shape index: {}]   ;;  %s497_s8 = inlined_call_operand.hbm [shape: f32[1,128], index: 8, kind: output, shape index: {}]  }
   0x1   :  { %v65_v0 = vld [vmem:[%s491_s2] sm:$0xff]  ;;  %311 = vset.pattern.permute.xlu1 %v356_v2  ;;  %310 = vset.pattern.permute.xlu0 %v356_v2  ;;  %v66_v3 = vld [vmem:[%s491_s2 + $0x8] sm:$0xff]  ;;  %v36_v5 = vld [vmem:[%s490_s1 + $0x18] sm:$0xff] }
   0x2   :  { %v33_v1 = vld [vmem:[%s490_s1] sm:$0xff]  ;;  %71 = vperm.xlu1 %311, %v65_v0   ;;  %v34_v4 = vld [vmem:[%s490_s1 + $0x8] sm:$0xff]  ;;  %v35_v6 = vld [vmem:[%s490_s1 + $0x10] sm:$0xff] }
   0x3   :  { %39 = vperm.xlu0 %310, %v33_v1  }
   0x6   :  { %76 = vperm.xlu1 %311, %v66_v3  }
   0x7   :  { %44 = vperm.xlu0 %310, %v34_v4  }
   0x8   :  { %14 = vsyncpa [#allocation4], 0  ;;  %v68_v7 = vld [vmem:[%s491_s2 + $0x18] sm:$0xff]  ;;  %v67_v8 = vld [vmem:[%s491_s2 + $0x10] sm:$0xff]  ;;  %vm173_vm0 = vcmask 261120   ;;  %v57_v22 = vlaneseq  ;;  %s357_s24 = smov [#allocation3]  }
   0x9   :  { %v102_v9 = vld [vmem:[%s492_s3 + $0x8] sm:$0xff]  ;;  %v101_v10 = vld [vmem:[%s492_s3] sm:$0xff]  ;;  %v104_v11 = vld [vmem:[%s492_s3 + $0x18] sm:$0xff]  ;;  %s284_s1 = sshll.u32 %s357_s24, 4  ;;  %s285_s1 = int_to_ptr.vmem [resolvable:$true] %s284_s1 }
   0xa   :  { %54 = vperm.xlu1 %311, %v36_v5   ;;  %v103_v12 = vld [vmem:[%s492_s3 + $0x10] sm:$0xff]  ;;  %v140_v13 = vld [vmem:[%s494_s5 + $0x8] sm:$0xff]  ;;  %v139_v14 = vld [vmem:[%s494_s5] sm:$0xff]  ;;  %v58_v23 = vshrl.u32 %v57_v22, 7  ;;  %s332_s25 = scalar_lea.vmem %s285_s1, 16  ;;  %s336_s26 = scalar_lea.vmem %s285_s1, 32 }
   0xb   :  { %49 = vperm.xlu0 %310, %v35_v6   ;;  %v142_v15 = vld [vmem:[%s494_s5 + $0x18] sm:$0xff]  ;;  %v141_v16 = vld [vmem:[%s494_s5 + $0x10] sm:$0xff]  ;;  %v234_v17 = vld [vmem:[%s495_s6 + $0x8] sm:$0xff]  ;;  %p333_p0 = scmp.ne.s32.totalorder %s285_s1, %s332_s25  ;;  %p337_p1 = scmp.lt.s32.totalorder %s285_s1, %s285_s1 }
   0xc   :  { %v233_v18 = vld [vmem:[%s495_s6] sm:$0xff]  ;;  %v236_v19 = vld [vmem:[%s495_s6 + $0x18] sm:$0xff]  ;;  %v235_v20 = vld [vmem:[%s495_s6 + $0x10] sm:$0xff]  ;;  %v91_v26 = vsub.s32 1, %v58_v23  ;;  %v59_v27 = vsub.s32 0, %v58_v23  ;;  %p338_p2 = scmp.lt.s32.totalorder %s336_s26, %s332_s25 }
   0xd   :  { %v312_v21 = vld [vmem:[%s493_s4] sm:$0xff]   ;;  %v313_v63 = vld [vmem:[%s493_s4 + $0x8] sm:$0xff]  }
   0xe   :  { %86 = vperm.xlu1 %311, %v68_v7   ;;  %304 = vmatprep.mubr.msk.bf16.mxu0 %vm173_vm0, %v312_v21  ;;  %v32_v28 = vld [vmem:[%s489_s0] sm:$0x3]  ;;  %p339_p3 = por %p338_p2, %p337_p1 }
   0xf   :  { %81 = vperm.xlu0 %310, %v67_v8   ;;  %v92_v31 = vrot.slane %v32_v28, %v91_v26  ;;  %v60_v32 = vrot.slane %v32_v28, %v59_v27 }
  0x10   :  { %p340_p4 = pnand %p339_p3, %p333_p0 }
  0x12   :  { %112 = vperm.xlu1 %311, %v102_v9  }
  0x13   :  { %107 = vperm.xlu0 %310, %v101_v10  }
  0x16   :  { %122 = vperm.xlu1 %311, %v104_v11  }
  0x17   :  { %117 = vperm.xlu0 %310, %v103_v12  }
  0x1a   :  { %150 = vperm.xlu1 %311, %v140_v13  }
  0x1b   :  { %145 = vperm.xlu0 %310, %v139_v14  }
  0x1e   :  { %160 = vperm.xlu1 %311, %v142_v15  }
  0x1f   :  { %155 = vperm.xlu0 %310, %v141_v16  }
  0x22   :  { %244 = vperm.xlu1 %311, %v234_v17  }
  0x23   :  { %239 = vperm.xlu0 %310, %v233_v18  }
  0x26   :  { %254 = vperm.xlu1 %311, %v236_v19  }
  0x27   :  { %249 = vperm.xlu0 %310, %v235_v20  }
  0x81   :  { %v72_v24 = vpop.permute.xlu1 %71 }
  0x82   :  { %v40_v25 = vpop.permute.xlu0 %39  ;;  %v93_v35 = vmul.f32 %v92_v31, %v72_v24 }
  0x83   :  { %v61_v36 = vmul.f32 %v60_v32, %v40_v25 }
  0x85   :  { %v77_v29 = vpop.permute.xlu1 %76  ;;  %v97_v44 = vadd.f32 %v93_v35, %v61_v36 }
  0x86   :  { %v45_v30 = vpop.permute.xlu0 %44  ;;  %v94_v37 = vmul.f32 %v92_v31, %v77_v29 }
  0x87   :  { %v62_v38 = vmul.f32 %v60_v32, %v45_v30 }
  0x89   :  { %v55_v33 = vpop.permute.xlu1 %54  ;;  %v98_v43 = vadd.f32 %v94_v37, %v62_v38 }
  0x8a   :  { %v50_v34 = vpop.permute.xlu0 %49  ;;  %v64_v47 = vmul.f32 %v60_v32, %v55_v33 }
  0x8b   :  { %v63_v48 = vmul.f32 %v60_v32, %v50_v34  ;;  %v271_v32 = vstv %s496_s7 }
  0x8d   :  { %v87_v39 = vpop.permute.xlu1 %86 }
  0x8e   :  { %v82_v40 = vpop.permute.xlu0 %81  ;;  %v96_v41 = vmul.f32 %v92_v31, %v87_v39 }
  0x8f   :  { %v95_v42 = vmul.f32 %v92_v31, %v82_v40 }
  0x90   :  { %v100_v51 = vadd.f32 %v96_v41, %v64_v47 }
  0x91   :  { %v113_v45 = vpop.permute.xlu1 %112  ;;  %v99_v52 = vadd.f32 %v95_v42, %v63_v48 }
  0x92   :  { %v108_v46 = vpop.permute.xlu0 %107  ;;  %v126_v49 = vadd.f32 %v113_v45, %v98_v43 }
  0x93   :  { %v125_v50 = vadd.f32 %v108_v46, %v97_v44 }
  0x94   :  { %314 = vtanh.f32 %v126_v49 }
  0x95   :  { %316 = vtanh.f32 %v125_v50  ;;  %v123_v53 = vpop.permute.xlu1 %122 }
  0x96   :  { %v118_v54 = vpop.permute.xlu0 %117  ;;  %v128_v55 = vadd.f32 %v123_v53, %v100_v51 }
  0x97   :  { %v127_v56 = vadd.f32 %v118_v54, %v99_v52 }
  0x98   :  { %318 = vtanh.f32 %v128_v55 }
  0x99   :  { %320 = vtanh.f32 %v127_v56  ;;  %v151_v1 = vpop.permute.xlu1 %150 }
  0x9a   :  { %v146_v0 = vpop.permute.xlu0 %145 }
  0x9d   :  { %v161_v8 = vpop.permute.xlu1 %160 }
  0x9e   :  { %v315_v57 = vpop.eup %314  ;;  %v156_v2 = vpop.permute.xlu0 %155 }
  0x9f   :  { %v317_v58 = vpop.eup %316 }
  0xa0   :  { %v137_v59 = vpack.c.bf16 %v315_v57, %v317_v58 }
  0xa1   :  { %v245_v14 = vpop.permute.xlu1 %244 }
  0xa2   :  { %v319_v60 = vpop.eup %318  ;;  %300 = vmatprep.subr.bf16.mxu0 %v137_v59  ;;  %v240_v12 = vpop.permute.xlu0 %239 }
  0xa3   :  { %v321_v61 = vpop.eup %320  ;;  %301 = vmatpush3.bf16.msra.mxu0 %v137_v59 }
  0xa4   :  { %v138_v62 = vpack.c.bf16 %v319_v60, %v321_v61 }
  0xa5   :  { %v255_v23 = vpop.permute.xlu1 %254 }
  0xa6   :  { %302 = vmatprep.subr.bf16.mxu0 %v138_v62  ;;  %v250_v20 = vpop.permute.xlu0 %249 }
  0xa7   :  { %303 = vmatpush3.bf16.msra.mxu0 %v138_v62 }
  0xaa   :  { %305 = vmatmul.mubr.msk.bf16.vlgmr.msra.gmra.mrb[0].mxu0 %vm173_vm0, %v313_v63 }
 0x17d   :  { %v306_v3 = vpop.f32.mrb[0].mxu0 }
 0x17e   :  { %v223_v4 = vadd.f32 %v306_v3, %v156_v2  ;;  %v214_v5 = vpop.f32.mrb[1].mxu0 }
 0x17f   :  { %v215_v6 = vadd.f32 %v214_v5, %v146_v0  ;;  %v307_v7 = vpop.f32.mrb[2].mxu0 }
 0x180   :  { %v217_v9 = vpop.f32.mrb[3].mxu0  ;;  %v226_v10 = vadd.f32 %v307_v7, %v161_v8 }
 0x181   :  { %322 = vtanh.f32 %v215_v6  ;;  %v218_v11 = vadd.f32 %v217_v9, %v151_v1 }
 0x182   :  { %324 = vtanh.f32 %v223_v4 }
 0x183   :  { %326 = vtanh.f32 %v218_v11 }
 0x184   :  { %328 = vtanh.f32 %v226_v10 }
 0x18b   :  { %v323_v13 = vpop.eup %322 }
 0x18c   :  { %v325_v15 = vpop.eup %324  ;;  %v257_v17 = vmul.f32 %v323_v13, %v240_v12 }
 0x18d   :  { %v327_v16 = vpop.eup %326  ;;  %v259_v21 = vmul.f32 %v325_v15, %v250_v20 }
 0x18e   :  { %v258_v18 = vmul.f32 %v327_v16, %v245_v14  ;;  %v329_v19 = vpop.eup %328 }
 0x18f   :  { %v260_v24 = vmul.f32 %v329_v19, %v255_v23 }
 0x190   :  { %v261_v22 = vadd.f32 %v258_v18, %v257_v17 }
 0x192   :  { %v262_v25 = vadd.f32 %v261_v22, %v259_v21 }
 0x194   :  { %v263_v26 = vadd.f32 %v262_v25, %v260_v24 }
 0x196   :  { %v264_v27 = vrot.slane %v263_v26, 4 }
 0x198   :  { %v265_v28 = vadd.f32 %v264_v27, %v263_v26 }
 0x19a   :  { %v266_v29 = vrot.slane %v265_v28, 2 }
 0x19c   :  { %v267_v30 = vadd.f32 %v266_v29, %v265_v28 }
 0x19e   :  { %v268_v31 = vrot.slane %v267_v30, 1 }
 0x1a0   :  { %v269_v33 = vadd.f32 %v268_v31, %v267_v30 }
 0x1a2   :  { %v272_v34 = vadd.f32 %v271_v32, %v269_v33 }
 0x1a4   :  { %v273_v35 = vmul.f32 0.5, %v272_v34 }
 0x1a6   :  { %330 = vtanh.f32 %v273_v35 }
 0x1b0   :  { %v331_v36 = vpop.eup %330 }
 0x1b1   :  { %v275_v37 = vmul.f32 0.5, %v331_v36 }
 0x1b3   :  { %v276_v38 = vadd.f32 0.5, %v275_v37 }
 0x1b5   :  { %277 = vst [vmem:[#allocation3] sm:$0x1] %v276_v38 }
 0x1b6   :  { %343 = shalt.err (!%p340_p4)
}
 0x1b7   :  { %s344_s2 = scalar_lea.hbm %s497_s8, 16 }
 0x1b8   :  { %p345_p5 = scmp.ne.s32.totalorder %s497_s8, %s344_s2  ;;  %p348_p6 = scmp.lt.u32.totalorder %s344_s2, %s497_s8 }
 0x1ba   :  { %p350_p7 = pnand %p348_p6, %p345_p5 }
 0x1bc   :  { %353 = shalt.err (!%p350_p7)
}
 0x1bd   :  { %287 = dma.vmem_to_hbm [thread:$0]  %s285_s1, 16, %s497_s8, [#allocation4]  }
 0x1be   :  { %354 = dma.done.wait [#allocation4], 16  }
 0x1bf   :  { %355 = vsyncadd [#allocation4], 4294967280 }
 0x1c0   :  { %291 = vsyncpa [#allocation4], 1 }

</bundles_post_ra>
